<compile_context>
chip_gen: v6e
topology: v6e:2x2x1
jax: 0.10.0
libtpu: 0.0.40
codegen_flags: <defaults>
</compile_context>

<pallas_src>
import numpy as np
import jax
import jax.numpy as jnp
from jax.experimental import pallas as pl
from jax.experimental.pallas import tpu as pltpu

HIDDEN = 256
LANE = 128


def _round_up(x, m):
    return ((x + m - 1) // m) * m


def _policy_kernel(x_ref, w1_ref, b1_ref, w2_ref, b2_ref, w3_ref, b3_ref,
                   mean_ref):
    # bf16 operands on the MXU, f32 accumulation; tanh/bias in f32 on EUP/VPU.
    x = x_ref[...].astype(jnp.bfloat16)
    h1 = jnp.tanh(
        jnp.dot(x, w1_ref[...], preferred_element_type=jnp.float32)
        + b1_ref[...])
    h2 = jnp.tanh(
        jnp.dot(h1.astype(jnp.bfloat16), w2_ref[...],
                preferred_element_type=jnp.float32)
        + b2_ref[...])
    # Lane-dense (128-wide) mean writeback -> unmasked vst.
    mean_ref[...] = (
        jnp.dot(h2.astype(jnp.bfloat16), w3_ref[...],
                preferred_element_type=jnp.float32)
        + b3_ref[...])


def prepare_policy_params(params):
    """One-time parameter preparation (hoisted out of the per-step hot path):
    bf16 weight casts, lane padding of the mean head to 128, 2-D bias views,
    and the batch-independent std."""
    w1, b1, w2, b2, w3, b3, log_std = params
    S = w1.shape[0]
    A = w3.shape[1]
    A_pad = _round_up(A, LANE)

    w3_p = jnp.pad(w3, ((0, 0), (0, A_pad - A))) if A_pad != A else w3
    b3_p = jnp.pad(b3, (0, A_pad - A)) if A_pad != A else b3

    return {
        "S": S,
        "A": A,
        "A_pad": A_pad,
        "w1": w1.astype(jnp.bfloat16),
        "b1": b1.reshape(1, HIDDEN).astype(jnp.float32),
        "w2": w2.astype(jnp.bfloat16),
        "b2": b2.reshape(1, HIDDEN).astype(jnp.float32),
        "w3": w3_p.astype(jnp.bfloat16),
        "b3": b3_p.reshape(1, A_pad).astype(jnp.float32),
        "std": jnp.maximum(jnp.exp(log_std), 1e-6).astype(jnp.float32),
    }


def _choose_batch_tile(B, *, max_tile=1024, megacore_threshold=1024):
    """Divisor-aware batch tile: big tiles to amortize per-step pipeline
    overhead, bounded padding waste, and an even number (>=2) of grid steps
    for large batches so v7x megacore sharding keeps both TCs busy."""
    B8 = _round_up(max(B, 8), 8)
    n_steps = max(1, -(-B8 // max_tile))
    if B8 >= megacore_threshold:
        n_steps = max(2, 2 * (-(-n_steps // 2)))   # even, >= 2
    tile = _round_up(-(-B8 // n_steps), 8)
    return tile


def policy_forward(states, prepared, *, max_batch_tile=1024,
                   return_padded=False):
    """Returns (mean, std) matching Policy.forward.

    If return_padded=True, mean is returned as the kernel's lane-dense
    (B_pad, 128) layout (rows >= B and lanes >= action_dim are zero-influenced
    padding) so callers can fuse/consume it without an extra HBM copy.
    """
    B, S = states.shape
    assert S == prepared["S"]
    A, A_pad = prepared["A"], prepared["A_pad"]

    tile_b = _choose_batch_tile(B, max_tile=max_batch_tile)
    B_pad = _round_up(max(B, 8), tile_b)
    if B_pad != B:
        states = jnp.pad(states, ((0, B_pad - B), (0, 0)))

    grid = (B_pad // tile_b,)

    flops = 2 * B_pad * (S * HIDDEN + HIDDEN * HIDDEN + HIDDEN * A_pad)
    transcendentals = 2 * B_pad * HIDDEN
    bytes_accessed = (4 * B_pad * (S + A_pad)
                      + 2 * (S * HIDDEN + HIDDEN * HIDDEN + HIDDEN * A_pad)
                      + 4 * (2 * HIDDEN + A_pad))

    mean_padded = pl.pallas_call(
        _policy_kernel,
        out_shape=jax.ShapeDtypeStruct((B_pad, A_pad), jnp.float32),
        grid_spec=pltpu.PrefetchScalarGridSpec(
            num_scalar_prefetch=0,
            grid=grid,
            in_specs=[
                pl.BlockSpec((tile_b, S), lambda i: (i, 0)),        # states tile
                pl.BlockSpec((S, HIDDEN), lambda i: (0, 0)),         # W1 (bf16)
                pl.BlockSpec((1, HIDDEN), lambda i: (0, 0)),         # b1
                pl.BlockSpec((HIDDEN, HIDDEN), lambda i: (0, 0)),    # W2 (bf16)
                pl.BlockSpec((1, HIDDEN), lambda i: (0, 0)),         # b2
                pl.BlockSpec((HIDDEN, A_pad), lambda i: (0, 0)),     # W3 (bf16, padded)
                pl.BlockSpec((1, A_pad), lambda i: (0, 0)),          # b3 (padded)
            ],
            out_specs=pl.BlockSpec((tile_b, A_pad), lambda i: (i, 0)),
        ),
        compiler_params=pltpu.CompilerParams(
            dimension_semantics=("parallel",)),
        cost_estimate=pl.CostEstimate(
            flops=flops, transcendentals=transcendentals,
            bytes_accessed=bytes_accessed),
    )(states, prepared["w1"], prepared["b1"], prepared["w2"], prepared["b2"],
      prepared["w3"], prepared["b3"])

    std = prepared["std"]
    if return_padded:
        return mean_padded, std
    # TODO(synk): for large-B training loops, prefer return_padded=True and let
    # the downstream consumer read the padded layout to avoid this copy.
    mean = mean_padded[:B, :A]
    return mean, std


# ---------------------------------------------------------------------------
# Deterministic parameter construction (mirrors the PyTorch __init__).
# ---------------------------------------------------------------------------
def _orthogonal(key, out_features, in_features, gain):
    """Orthogonal init like nn.init.orthogonal_ on a (out, in) weight,
    returned transposed as (in, out) for the kernel's x @ W convention."""
    n = max(out_features, in_features)
    a = jax.random.normal(key, (n, n), dtype=jnp.float32)
    q, r = jnp.linalg.qr(a)
    q = q * jnp.sign(jnp.diag(r))                # deterministic sign fix
    w = gain * q[:out_features, :in_features]    # (out, in) like torch
    return jnp.asarray(w.T, dtype=jnp.float32)   # (in, out) for kernel


def make_policy_params(key, state_dim, action_dim):
    k1, k2, k3 = jax.random.split(key, 3)
    w1 = _orthogonal(k1, HIDDEN, state_dim, np.sqrt(2.0))
    b1 = jnp.zeros((HIDDEN,), jnp.float32)
    w2 = _orthogonal(k2, HIDDEN, HIDDEN, np.sqrt(2.0))
    b2 = jnp.zeros((HIDDEN,), jnp.float32)
    w3 = _orthogonal(k3, action_dim, HIDDEN, 0.01)
    b3 = jnp.zeros((action_dim,), jnp.float32)
    log_std = jnp.ones((action_dim,), jnp.float32) * -0.5
    return (w1, b1, w2, b2, w3, b3, log_std)


def _reference_forward(states, params):
    """Full-f32 reference (PyTorch-faithful)."""
    w1, b1, w2, b2, w3, b3, log_std = params
    h1 = jnp.tanh(states @ w1 + b1)
    h2 = jnp.tanh(h1 @ w2 + b2)
    mean = h2 @ w3 + b3
    std = jnp.maximum(jnp.exp(log_std), 1e-6)
    return mean, std


if __name__ == "__main__":
    key = jax.random.PRNGKey(0)
    k_param, k_state = jax.random.split(key)

    state_dim = 32
    action_dim = 8
    raw_params = make_policy_params(k_param, state_dim, action_dim)
    prepared = prepare_policy_params(raw_params)

    # Case 1: tile-aligned small batch.
    batch = 8
    states = jax.random.normal(k_state, (batch, state_dim), dtype=jnp.float32)
    mean, std = policy_forward(states, prepared)
    mean = jax.block_until_ready(mean)
    std = jax.block_until_ready(std)

    ref_mean, ref_std = _reference_forward(states, raw_params)
    # std path is exact (pure f32, computed once in prepare_policy_params).
    np.testing.assert_allclose(np.asarray(std), np.asarray(ref_std),
                               rtol=1e-6, atol=1e-6)
    # mean uses bf16 MXU operands with f32 accumulation -> loosened tolerance
    # vs. the full-f32 reference (as flagged in the review).
    np.testing.assert_allclose(np.asarray(mean), np.asarray(ref_mean),
                               rtol=5e-2, atol=5e-4)
    assert mean.shape == (batch, action_dim)
    assert std.shape == (action_dim,)

    # Case 2: batch not a multiple of 8 — exercises wrapper-side padding path.
    batch2 = 12
    states2 = jax.random.normal(jax.random.PRNGKey(7), (batch2, state_dim),
                                dtype=jnp.float32)
    mean2, std2 = policy_forward(states2, prepared)
    mean2 = jax.block_until_ready(mean2)
    ref_mean2, _ = _reference_forward(states2, raw_params)
    np.testing.assert_allclose(np.asarray(mean2), np.asarray(ref_mean2),
                               rtol=5e-2, atol=5e-4)
    assert mean2.shape == (batch2, action_dim)

    # Case 3: padded-output fast path (no wrapper slice copy).
    mean3_padded, _ = policy_forward(states, prepared, return_padded=True)
    mean3_padded = jax.block_until_ready(mean3_padded)
    np.testing.assert_allclose(np.asarray(mean3_padded[:batch, :action_dim]),
                               np.asarray(ref_mean), rtol=5e-2, atol=5e-4)

    print("KERNEL_OK")
</pallas_src>

<mosaic_0001>
module attributes {stable_mosaic.version = 11 : i64} {
  func.func @_policy_kernel(%arg0: i32, %arg1: memref<8x32xf32, #tpu.memory_space<vmem>>, %arg2: memref<32x256xbf16, #tpu.memory_space<vmem>>, %arg3: memref<1x256xf32, #tpu.memory_space<vmem>>, %arg4: memref<256x256xbf16, #tpu.memory_space<vmem>>, %arg5: memref<1x256xf32, #tpu.memory_space<vmem>>, %arg6: memref<256x128xbf16, #tpu.memory_space<vmem>>, %arg7: memref<1x128xf32, #tpu.memory_space<vmem>>, %arg8: memref<8x128xf32, #tpu.memory_space<vmem>>) attributes {dimension_semantics = [#tpu.dimension_semantics<parallel>], iteration_bounds = array<i64: 1>, scalar_prefetch = 0 : i64, scratch_operands = 0 : i64, tpu.core_type = #tpu.core_type<tc>, window_params = [{transform_indices = @transform_0, window_bounds = array<i64: 8, 32>}, {pipeline_mode = #tpu.pipeline_mode<synchronous>, transform_indices = @transform_1, window_bounds = array<i64: 32, 256>}, {pipeline_mode = #tpu.pipeline_mode<synchronous>, transform_indices = @transform_2, window_bounds = array<i64: 1, 256>}, {pipeline_mode = #tpu.pipeline_mode<synchronous>, transform_indices = @transform_3, window_bounds = array<i64: 256, 256>}, {pipeline_mode = #tpu.pipeline_mode<synchronous>, transform_indices = @transform_4, window_bounds = array<i64: 1, 256>}, {pipeline_mode = #tpu.pipeline_mode<synchronous>, transform_indices = @transform_5, window_bounds = array<i64: 256, 128>}, {pipeline_mode = #tpu.pipeline_mode<synchronous>, transform_indices = @transform_6, window_bounds = array<i64: 1, 128>}, {transform_indices = @transform_7, window_bounds = array<i64: 8, 128>}]} {
    %c0 = arith.constant 0 : index
    %c0_0 = arith.constant 0 : index
    %0 = vector.load %arg1[%c0, %c0_0] : memref<8x32xf32, #tpu.memory_space<vmem>>, vector<8x32xf32>
    %1 = arith.truncf %0 : vector<8x32xf32> to vector<8x32xbf16>
    %c0_1 = arith.constant 0 : index
    %c0_2 = arith.constant 0 : index
    %2 = vector.load %arg2[%c0_1, %c0_2] : memref<32x256xbf16, #tpu.memory_space<vmem>>, vector<32x256xbf16>
    %cst = arith.constant dense<0.000000e+00> : vector<8x256xf32>
    %3 = tpu.matmul %1, %2, %cst {dimension_numbers = #tpu.dot_dimension_numbers<[1], [0], [0], [1], [0, 0, 1, 1], [], []>} : vector<8x32xbf16>, vector<32x256xbf16>, vector<8x256xf32> -> vector<8x256xf32>
    %c0_3 = arith.constant 0 : index
    %c0_4 = arith.constant 0 : index
    %4 = vector.load %arg3[%c0_3, %c0_4] : memref<1x256xf32, #tpu.memory_space<vmem>>, vector<1x256xf32>
    %5 = vector.broadcast %4 : vector<1x256xf32> to vector<8x256xf32>
    %6 = arith.addf %3, %5 : vector<8x256xf32>
    %7 = math.tanh %6 : vector<8x256xf32>
    %8 = arith.truncf %7 : vector<8x256xf32> to vector<8x256xbf16>
    %c0_5 = arith.constant 0 : index
    %c0_6 = arith.constant 0 : index
    %9 = vector.load %arg4[%c0_5, %c0_6] : memref<256x256xbf16, #tpu.memory_space<vmem>>, vector<256x256xbf16>
    %cst_7 = arith.constant dense<0.000000e+00> : vector<8x256xf32>
    %10 = tpu.matmul %8, %9, %cst_7 {dimension_numbers = #tpu.dot_dimension_numbers<[1], [0], [0], [1], [0, 0, 1, 1], [], []>} : vector<8x256xbf16>, vector<256x256xbf16>, vector<8x256xf32> -> vector<8x256xf32>
    %c0_8 = arith.constant 0 : index
    %c0_9 = arith.constant 0 : index
    %11 = vector.load %arg5[%c0_8, %c0_9] : memref<1x256xf32, #tpu.memory_space<vmem>>, vector<1x256xf32>
    %12 = vector.broadcast %11 : vector<1x256xf32> to vector<8x256xf32>
    %13 = arith.addf %10, %12 : vector<8x256xf32>
    %14 = math.tanh %13 : vector<8x256xf32>
    %15 = arith.truncf %14 : vector<8x256xf32> to vector<8x256xbf16>
    %c0_10 = arith.constant 0 : index
    %c0_11 = arith.constant 0 : index
    %16 = vector.load %arg6[%c0_10, %c0_11] : memref<256x128xbf16, #tpu.memory_space<vmem>>, vector<256x128xbf16>
    %cst_12 = arith.constant dense<0.000000e+00> : vector<8x128xf32>
    %17 = tpu.matmul %15, %16, %cst_12 {dimension_numbers = #tpu.dot_dimension_numbers<[1], [0], [0], [1], [0, 0, 1, 1], [], []>} : vector<8x256xbf16>, vector<256x128xbf16>, vector<8x128xf32> -> vector<8x128xf32>
    %c0_13 = arith.constant 0 : index
    %c0_14 = arith.constant 0 : index
    %18 = vector.load %arg7[%c0_13, %c0_14] : memref<1x128xf32, #tpu.memory_space<vmem>>, vector<1x128xf32>
    %19 = vector.broadcast %18 : vector<1x128xf32> to vector<8x128xf32>
    %20 = arith.addf %17, %19 : vector<8x128xf32>
    %c0_15 = arith.constant 0 : index
    %c0_16 = arith.constant 0 : index
    %21 = vector.load %arg8[%c0_15, %c0_16] : memref<8x128xf32, #tpu.memory_space<vmem>>, vector<8x128xf32>
    tpu.vector_store %arg8[%c0_15, %c0_16], %20 {strides = array<i32>} : memref<8x128xf32, #tpu.memory_space<vmem>>, vector<8x128xf32>,
    return
  }
  func.func @transform_0(%arg0: i32) -> (i32, i32) {
    %c0_i32 = arith.constant 0 : i32
    %c0_i32_0 = arith.constant 0 : i32
    return %arg0, %c0_i32 : i32, i32
  }
  func.func @transform_1(%arg0: i32) -> (i32, i32) {
    %c0_i32 = arith.constant 0 : i32
    %c0_i32_0 = arith.constant 0 : i32
    %c0_i32_1 = arith.constant 0 : i32
    return %c0_i32, %c0_i32_0 : i32, i32
  }
  func.func @transform_2(%arg0: i32) -> (i32, i32) {
    %c0_i32 = arith.constant 0 : i32
    %c0_i32_0 = arith.constant 0 : i32
    %c0_i32_1 = arith.constant 0 : i32
    return %c0_i32, %c0_i32_0 : i32, i32
  }
  func.func @transform_3(%arg0: i32) -> (i32, i32) {
    %c0_i32 = arith.constant 0 : i32
    %c0_i32_0 = arith.constant 0 : i32
    %c0_i32_1 = arith.constant 0 : i32
    return %c0_i32, %c0_i32_0 : i32, i32
  }
  func.func @transform_4(%arg0: i32) -> (i32, i32) {
    %c0_i32 = arith.constant 0 : i32
    %c0_i32_0 = arith.constant 0 : i32
    %c0_i32_1 = arith.constant 0 : i32
    return %c0_i32, %c0_i32_0 : i32, i32
  }
  func.func @transform_5(%arg0: i32) -> (i32, i32) {
    %c0_i32 = arith.constant 0 : i32
    %c0_i32_0 = arith.constant 0 : i32
    %c0_i32_1 = arith.constant 0 : i32
    return %c0_i32, %c0_i32_0 : i32, i32
  }
  func.func @transform_6(%arg0: i32) -> (i32, i32) {
    %c0_i32 = arith.constant 0 : i32
    %c0_i32_0 = arith.constant 0 : i32
    %c0_i32_1 = arith.constant 0 : i32
    return %c0_i32, %c0_i32_0 : i32, i32
  }
  func.func @transform_7(%arg0: i32) -> (i32, i32) {
    %c0_i32 = arith.constant 0 : i32
    %c0_i32_0 = arith.constant 0 : i32
    return %arg0, %c0_i32 : i32, i32
  }
}

</mosaic_0001>

<bundles_post_ra>
// kernel: tpu_custom_call.1
= control target key start
LH: loop header
LB: loop body
LE: loop exit
PB: predicated region body
PF: predicated region fallthrough
CT: control target
= control target key end

     0   :  { %12 = vsyncpa [#allocation3], 0  ;;  %s956_s0 = inlined_call_operand.hbm [shape: f32[8,32], index: 0, kind: input, shape index: {}]   ;;  %s957_s1 = inlined_call_operand.hbm [shape: bf16[32,256], index: 1, kind: input, shape index: {}]   ;;  %s958_s2 = inlined_call_operand.vmem [shape: f32[1,256], index: 2, kind: input, shape index: {}]   ;;  %s959_s3 = inlined_call_operand.hbm [shape: bf16[256,256], index: 3, kind: input, shape index: {}]   ;;  %s960_s4 = inlined_call_operand.vmem [shape: f32[1,256], index: 4, kind: input, shape index: {}]   ;;  %s961_s5 = inlined_call_operand.hbm [shape: bf16[256,128], index: 5, kind: input, shape index: {}]   ;;  %s962_s6 = inlined_call_operand.vmem [shape: f32[1,128], index: 6, kind: input, shape index: {}]   ;;  %s963_s7 = inlined_call_operand.hbm [shape: f32[8,128], index: 7, kind: output, shape index: {}]  }
   0x1   :  { %13 = vsyncpa [#allocation6], 0 }
   0x2   :  { %14 = vsyncpa [#allocation9], 0 }
   0x3   :  { %15 = vsyncpa [#allocation4], 0  ;;  %s882_s24 = smov [#allocation5]  }
   0x4   :  { %s31_s25 = sshll.u32 %s882_s24, 4  ;;  %s32_s25 = int_to_ptr.vmem [resolvable:$true] %s31_s25 }
   0x5   :  { %s782_s26 = scalar_lea.vmem %s32_s25, 512  ;;  %p787_p1 = scmp.lt.s32.totalorder %s32_s25, %s32_s25 }
   0x6   :  { %p783_p0 = scmp.ne.s32.totalorder %s32_s25, %s782_s26  ;;  %p788_p2 = scmp.lt.s32.totalorder %s782_s26, %s782_s26 }
   0x8   :  { %p789_p3 = por %p788_p2, %p787_p1 }
   0xa   :  { %p790_p4 = pnand %p789_p3, %p783_p0 }
   0xc   :  { %793 = shalt.err (!%p790_p4)
}
   0xd   :  { %s883_s27 = smov 128   ;;  %s884_s28 = smov 8  }
   0xe   :  { %37 = dma.hbm_to_vmem [thread:$0]  %s957_s1, 512, %s32_s25, [#allocation6], %s883_s27, %s883_s27, %s884_s28  }
   0xf   :  { %s885_s8 = smov [#allocation2]   ;;  %s886_s10 = smov [#allocation7]  }
  0x10   :  { %s22_s9 = sshll.u32 %s885_s8, 4  ;;  %s45_s11 = sshll.u32 %s886_s10, 4  ;;  %s23_s9 = int_to_ptr.vmem [resolvable:$true] %s22_s9  ;;  %s46_s11 = int_to_ptr.vmem [resolvable:$true] %s45_s11 }
  0x11   :  { %s802_s12 = scalar_lea.vmem %s23_s9, 128  ;;  %p807_p6 = scmp.lt.s32.totalorder %s23_s9, %s23_s9 }
  0x12   :  { %p803_p5 = scmp.ne.s32.totalorder %s23_s9, %s802_s12  ;;  %p808_p7 = scmp.lt.s32.totalorder %s802_s12, %s802_s12 }
  0x14   :  { %p809_p8 = por %p808_p7, %p807_p6 }
  0x16   :  { %p810_p9 = pnand %p809_p8, %p803_p5 }
  0x18   :  { %813 = shalt.err (!%p810_p9)
}
  0x19   :  { %25 = dma.hbm_to_vmem [thread:$0]  %s956_s0, 128, %s23_s9, [#allocation3]  }
  0x1a   :  { %s822_s15 = scalar_lea.vmem %s46_s11, 4096  ;;  %p827_p11 = scmp.lt.s32.totalorder %s46_s11, %s46_s11 }
  0x1b   :  { %p823_p10 = scmp.ne.s32.totalorder %s46_s11, %s822_s15  ;;  %p828_p12 = scmp.lt.s32.totalorder %s822_s15, %s822_s15 }
  0x1d   :  { %p829_p13 = por %p828_p12, %p827_p11 }
  0x1f   :  { %p830_p0 = pnand %p829_p13, %p823_p10 }
  0x21   :  { %833 = shalt.err (!%p830_p0)
}
  0x22   :  { %51 = dma.hbm_to_vmem [thread:$0]  %s959_s3, 4096, %s46_s11, [#allocation6], %s883_s27, %s883_s27, %s884_s28  }
  0x23   :  { %s887_s17 = smov [#allocation8]  }
  0x24   :  { %s59_s18 = sshll.u32 %s887_s17, 4  ;;  %s60_s18 = int_to_ptr.vmem [resolvable:$true] %s59_s18 }
  0x25   :  { %s842_s19 = scalar_lea.vmem %s60_s18, 2048  ;;  %p847_p2 = scmp.lt.s32.totalorder %s60_s18, %s60_s18 }
  0x26   :  { %p843_p1 = scmp.ne.s32.totalorder %s60_s18, %s842_s19  ;;  %p848_p3 = scmp.lt.s32.totalorder %s842_s19, %s842_s19 }
  0x28   :  { %p849_p4 = por %p848_p3, %p847_p2 }
  0x2a   :  { %p850_p5 = pnand %p849_p4, %p843_p1 }
  0x2c   :  { %853 = shalt.err (!%p850_p5)
}
  0x2d   :  { %s888_s0 = smov 64   ;;  %s889_s20 = smov 4  }
  0x2e   :  { %65 = dma.hbm_to_vmem [thread:$0]  %s961_s5, 2048, %s60_s18, [#allocation9], %s888_s0, %s888_s0, %s889_s20  }
  0x2f   :  { %874 = dma.done.wait [#allocation3], 128  }
  0x30   :  { %875 = vsyncadd [#allocation3], 4294967168 }
  0x31   :  { %876 = dma.done.wait [#allocation6], 4608  }
  0x32   :  { %877 = vsyncadd [#allocation6], 4294962688 }
  0x33   :  { %878 = dma.done.wait [#allocation9], 2048  }
  0x34   :  { %879 = vsyncadd [#allocation9], 4294965248  ;;  %v890_v0 = vmov 0   ;;  %v696_v1 = vld [vmem:[#allocation5 + $0x14] ss:$8 sps:$4 sm:$0xff]   ;;  %vm119_vm0 = vcmask 261120   ;;  %v89_v45 = vlaneseq }
  0x35   :  { %155 = vmatprep.mubr.bf16.mxu0 %v890_v0  ;;  %v698_v2 = vld [vmem:[#allocation5 + $0x10] ss:$8 sps:$4 sm:$0xff]   ;;  %135 = vmatprep.subr.bf16.mxu0 %v696_v1  ;;  %v699_v3 = vld [vmem:[#allocation5 + $0x4] ss:$8 sps:$4 sm:$0xff]   ;;  %v701_v4 = vld [vmem:[#allocation5] ss:$8 sps:$4 sm:$0xff]  }
  0x36   :  { %v81_v5 = vld [vmem:[#allocation2] sm:$0xff]  ;;  %136 = vmatpush1.bf16.msra.mxu0 %v698_v2  ;;  %v705_v8 = vld [vmem:[#allocation7 + $0x64] ss:$8 sps:$4 sm:$0xff]   ;;  %v707_v10 = vld [vmem:[#allocation7 + $0x60] ss:$8 sps:$4 sm:$0xff]   ;;  %v90_v46 = vshrl.u32 %v89_v45, 7 }
  0x37   :  { %v702_v6 = vld [vmem:[#allocation7 + $0x74] ss:$8 sps:$4 sm:$0xff]   ;;  %137 = vmatprep.subr.bf16.mxu0 %v699_v3  ;;  %v704_v7 = vld [vmem:[#allocation7 + $0x70] ss:$8 sps:$4 sm:$0xff]   ;;  %v82_v9 = vpack.c.bf16 %v81_v5, %v81_v5  ;;  %v711_v13 = vld [vmem:[#allocation7 + $0x44] ss:$8 sps:$4 sm:$0xff]  }
  0x38   :  { %372 = vmatprep.subr.bf16.mxu1 %v702_v6  ;;  %v708_v11 = vld [vmem:[#allocation7 + $0x54] ss:$8 sps:$4 sm:$0xff]   ;;  %v710_v12 = vld [vmem:[#allocation7 + $0x50] ss:$8 sps:$4 sm:$0xff]   ;;  %v713_v14 = vld [vmem:[#allocation7 + $0x40] ss:$8 sps:$4 sm:$0xff]  }
  0x39   :  { %373 = vmatpush1.bf16.msra.mxu1 %v704_v7  ;;  %v714_v15 = vld [vmem:[#allocation7 + $0x34] ss:$8 sps:$4 sm:$0xff]   ;;  %v716_v16 = vld [vmem:[#allocation7 + $0x30] ss:$8 sps:$4 sm:$0xff]   ;;  %v717_v17 = vld [vmem:[#allocation7 + $0x24] ss:$8 sps:$4 sm:$0xff]  }
  0x3a   :  { %138 = vmatpush1.bf16.msra.mxu0 %v701_v4  ;;  %374 = vmatprep.subr.bf16.mxu1 %v705_v8  ;;  %v719_v18 = vld [vmem:[#allocation7 + $0x20] ss:$8 sps:$4 sm:$0xff]   ;;  %v720_v19 = vld [vmem:[#allocation7 + $0x14] ss:$8 sps:$4 sm:$0xff]   ;;  %v722_v20 = vld [vmem:[#allocation7 + $0x10] ss:$8 sps:$4 sm:$0xff]  }
  0x3b   :  { %v723_v21 = vld [vmem:[#allocation7 + $0x4] ss:$8 sps:$4 sm:$0xff]   ;;  %v725_v22 = vld [vmem:[#allocation7] ss:$8 sps:$4 sm:$0xff]   ;;  %v726_v23 = vld [vmem:[#allocation7 + $0xf4] ss:$8 sps:$4 sm:$0xff]  }
  0x3c   :  { %v728_v24 = vld [vmem:[#allocation7 + $0xf0] ss:$8 sps:$4 sm:$0xff]   ;;  %v729_v25 = vld [vmem:[#allocation7 + $0xe4] ss:$8 sps:$4 sm:$0xff]   ;;  %v731_v26 = vld [vmem:[#allocation7 + $0xe0] ss:$8 sps:$4 sm:$0xff]  }
  0x3d   :  { %614 = vmatmul.mubr.msk.bf16.vlgmr.msra.gmra.mxu0 %vm119_vm0, %v82_v9  ;;  %375 = vmatpush1.bf16.msra.mxu1 %v707_v10  ;;  %v732_v27 = vld [vmem:[#allocation7 + $0xd4] ss:$8 sps:$4 sm:$0xff]   ;;  %v734_v28 = vld [vmem:[#allocation7 + $0xd0] ss:$8 sps:$4 sm:$0xff]   ;;  %v735_v29 = vld [vmem:[#allocation7 + $0xc4] ss:$8 sps:$4 sm:$0xff]  }
  0x3e   :  { %376 = vmatprep.subr.bf16.mxu1 %v708_v11  ;;  %v737_v30 = vld [vmem:[#allocation7 + $0xc0] ss:$8 sps:$4 sm:$0xff]   ;;  %v738_v31 = vld [vmem:[#allocation7 + $0xb4] ss:$8 sps:$4 sm:$0xff]   ;;  %v740_v32 = vld [vmem:[#allocation7 + $0xb0] ss:$8 sps:$4 sm:$0xff]  }
  0x3f   :  { %v741_v33 = vld [vmem:[#allocation7 + $0xa4] ss:$8 sps:$4 sm:$0xff]   ;;  %v743_v34 = vld [vmem:[#allocation7 + $0xa0] ss:$8 sps:$4 sm:$0xff]   ;;  %v744_v35 = vld [vmem:[#allocation7 + $0x94] ss:$8 sps:$4 sm:$0xff]  }
  0x40   :  { %v746_v36 = vld [vmem:[#allocation7 + $0x90] ss:$8 sps:$4 sm:$0xff]   ;;  %v747_v37 = vld [vmem:[#allocation7 + $0x84] ss:$8 sps:$4 sm:$0xff]   ;;  %v749_v38 = vld [vmem:[#allocation7 + $0x80] ss:$8 sps:$4 sm:$0xff]  }
  0x41   :  { %377 = vmatpush1.bf16.msra.mxu1 %v710_v12  ;;  %v750_v39 = vld [vmem:[#allocation8 + $0x78] sm:$0xff]   ;;  %v752_v41 = vld [vmem:[#allocation8 + $0x70] sm:$0xff]   ;;  %v754_v43 = vld [vmem:[#allocation8 + $0x68] sm:$0xff]   ;;  %v91_v47 = vsub.s32 0, %v90_v46  ;;  %v95_v49 = vsub.s32 1, %v90_v46 }
  0x42   :  { %378 = vmatprep.subr.bf16.mxu1 %v711_v13  ;;  %v751_v40 = vld [vmem:[#allocation8 + $0x38] sm:$0xff]   ;;  %664 = vmatprep.subr.bf16.mxu0 %v750_v39  ;;  %v753_v42 = vld [vmem:[#allocation8 + $0x30] sm:$0xff]   ;;  %v755_v44 = vld [vmem:[#allocation8 + $0x28] sm:$0xff]  }
  0x43   :  { %665 = vmatpush3.bf16.msra.mxu0 %v751_v40  ;;  %v87_v48 = vld [vmem:[%s958_s2] sm:$0x3]  ;;  %v756_v62 = vld [vmem:[#allocation8 + $0x60] sm:$0xff]   ;;  %v760_v2 = vld [vmem:[#allocation8 + $0x50] sm:$0xff]  }
  0x44   :  { %666 = vmatprep.subr.bf16.mxu0 %v752_v41  ;;  %v92_v50 = vrot.slane %v87_v48, %v91_v47  ;;  %v96_v51 = vrot.slane %v87_v48, %v95_v49  ;;  %v757_v63 = vld [vmem:[#allocation8 + $0x20] sm:$0xff]   ;;  %v758_v0 = vld [vmem:[#allocation8 + $0x58] sm:$0xff]   ;;  %v761_v3 = vld [vmem:[#allocation8 + $0x10] sm:$0xff]  }
  0x45   :  { %379 = vmatpush1.bf16.msra.mxu1 %v713_v14  ;;  %v759_v1 = vld [vmem:[#allocation8 + $0x18] sm:$0xff]   ;;  %v762_v4 = vld [vmem:[#allocation8 + $0x48] sm:$0xff]   ;;  %v764_v6 = vld [vmem:[#allocation8 + $0x40] sm:$0xff]  }
  0x46   :  { %380 = vmatprep.subr.bf16.mxu1 %v714_v15  ;;  %v763_v5 = vld [vmem:[#allocation8 + $0x8] sm:$0xff]   ;;  %v765_v7 = vld [vmem:[#allocation8] sm:$0xff]   ;;  %v200_v8 = vld [vmem:[%s960_s4] sm:$0x3]  ;;  %s891_s4 = smov [#allocation10]  }
  0x47   :  { %667 = vmatpush3.bf16.msra.mxu0 %v753_v42  ;;  %v205_v9 = vrot.slane %v200_v8, %v91_v47  ;;  %v209_v10 = vrot.slane %v200_v8, %v95_v49  ;;  %s599_s26 = sshll.u32 %s891_s4, 4  ;;  %s600_s26 = int_to_ptr.vmem [resolvable:$true] %s599_s26 }
  0x48   :  { %668 = vmatprep.subr.bf16.mxu0 %v754_v43  ;;  %s854_s27 = scalar_lea.vmem %s600_s26, 128  ;;  %p859_p7 = scmp.lt.s32.totalorder %s600_s26, %s600_s26 }
  0x49   :  { %381 = vmatpush1.bf16.msra.mxu1 %v716_v16  ;;  %p855_p6 = scmp.ne.s32.totalorder %s600_s26, %s854_s27  ;;  %p860_p8 = scmp.lt.s32.totalorder %s854_s27, %s854_s27 }
  0x4a   :  { %382 = vmatprep.subr.bf16.mxu1 %v717_v17 }
  0x4b   :  { %669 = vmatpush3.bf16.msra.mxu0 %v755_v44  ;;  %p861_p9 = por %p860_p8, %p859_p7 }
  0x4c   :  { %670 = vmatprep.subr.bf16.mxu0 %v756_v62 }
  0x4d   :  { %383 = vmatpush1.bf16.msra.mxu1 %v719_v18  ;;  %p862_p10 = pnand %p861_p9, %p855_p6 }
  0x4e   :  { %384 = vmatprep.subr.bf16.mxu1 %v720_v19 }
  0x4f   :  { %671 = vmatpush3.bf16.msra.mxu0 %v757_v63 }
  0x50   :  { %672 = vmatprep.subr.bf16.mxu0 %v758_v0 }
  0x51   :  { %385 = vmatpush1.bf16.msra.mxu1 %v722_v20 }
  0x52   :  { %386 = vmatprep.subr.bf16.mxu1 %v723_v21 }
  0x53   :  { %673 = vmatpush3.bf16.msra.mxu0 %v759_v1 }
  0x54   :  { %674 = vmatprep.subr.bf16.mxu0 %v760_v2 }
  0x55   :  { %387 = vmatpush1.bf16.msra.mxu1 %v725_v22  ;;  %v647_v22 = vld [vmem:[%s962_s6] ss:$0 sm:$0xff] }
  0x56   :  { %388 = vmatprep.subr.bf16.mxu1 %v726_v23 }
  0x57   :  { %675 = vmatpush3.bf16.msra.mxu0 %v761_v3 }
  0x58   :  { %676 = vmatprep.subr.bf16.mxu0 %v762_v4 }
  0x59   :  { %389 = vmatpush2.bf16.msra.mxu1 %v728_v24 }
  0x5a   :  { %390 = vmatprep.subr.bf16.mxu1 %v729_v25 }
  0x5b   :  { %677 = vmatpush3.bf16.msra.mxu0 %v763_v5 }
  0x5c   :  { %678 = vmatprep.subr.bf16.mxu0 %v764_v6 }
  0x5d   :  { %391 = vmatpush2.bf16.msra.mxu1 %v731_v26 }
  0x5e   :  { %392 = vmatprep.subr.bf16.mxu1 %v732_v27 }
  0x5f   :  { %679 = vmatpush3.bf16.msra.mxu0 %v765_v7 }
  0x61   :  { %393 = vmatpush2.bf16.msra.mxu1 %v734_v28 }
  0x62   :  { %394 = vmatprep.subr.bf16.mxu1 %v735_v29 }
  0x65   :  { %395 = vmatpush2.bf16.msra.mxu1 %v737_v30 }
  0x66   :  { %396 = vmatprep.subr.bf16.mxu1 %v738_v31 }
  0x69   :  { %397 = vmatpush2.bf16.msra.mxu1 %v740_v32 }
  0x6a   :  { %398 = vmatprep.subr.bf16.mxu1 %v741_v33 }
  0x6d   :  { %399 = vmatpush2.bf16.msra.mxu1 %v743_v34 }
  0x6e   :  { %400 = vmatprep.subr.bf16.mxu1 %v744_v35 }
  0x71   :  { %401 = vmatpush2.bf16.msra.mxu1 %v746_v36 }
  0x72   :  { %402 = vmatprep.subr.bf16.mxu1 %v747_v37 }
  0x75   :  { %403 = vmatpush2.bf16.msra.mxu1 %v749_v38 }
  0xfd   :  { %v157_v52 = vpop.f32.mrf.mxu0 }
  0xfe   :  { %v158_v53 = vadd.f32 %v157_v52, %v92_v50 }
  0xff   :  { %v159_v54 = vpop.f32.mrf.mxu0 }
 0x100   :  { %v160_v55 = vadd.f32 %v159_v54, %v96_v51  ;;  %766 = vtanh.f32 %v158_v53 }
 0x101   :  { %v161_v56 = vpop.f32.mrf.mxu0 }
 0x102   :  { %768 = vtanh.f32 %v160_v55 }
 0x103   :  { %v162_v57 = vpop.f32.mrf.mxu0 }
 0x10d   :  { %v767_v58 = vpop.eup %766 }
 0x10e   :  { %v166_v61 = vpack.c.bf16 %v767_v58, %v767_v58 }
 0x10f   :  { %v769_v59 = vpop.eup %768 }
 0x110   :  { %v167_v60 = vpack.c.bf16 %v769_v59, %v769_v59 }
 0x112   :  { %404 = vmatprep.mubr.bf16.mxu1 %v167_v60 }
 0x113   :  { %405 = vmatmul.mubr.bf16.vlgmr.msra.gmra.mxu1 %v166_v61 }
 0x1d3   :  { %v406_v11 = vpop.f32.mrf.mxu1 }
 0x1d4   :  { %v407_v12 = vadd.f32 %v406_v11, %v205_v9 }
 0x1d5   :  { %v408_v13 = vpop.f32.mrf.mxu1 }
 0x1d6   :  { %v409_v14 = vadd.f32 %v408_v13, %v209_v10  ;;  %770 = vtanh.f32 %v407_v12 }
 0x1d7   :  { %v410_v15 = vpop.f32.mrf.mxu1 }
 0x1d8   :  { %772 = vtanh.f32 %v409_v14 }
 0x1d9   :  { %v411_v16 = vpop.f32.mrf.mxu1 }
 0x1e3   :  { %v771_v17 = vpop.eup %770 }
 0x1e4   :  { %v415_v20 = vpack.c.bf16 %v771_v17, %v771_v17 }
 0x1e5   :  { %v773_v18 = vpop.eup %772 }
 0x1e6   :  { %v416_v19 = vpack.c.bf16 %v773_v18, %v773_v18 }
 0x1e8   :  { %584 = vmatprep.mubr.bf16.mxu0 %v416_v19 }
 0x1e9   :  { %585 = vmatmul.mubr.bf16.vlgmr.msra.gmra.mxu0 %v415_v20 }
 0x2a9   :  { %v680_v21 = vpop.f32.mrf.mxu0 }
 0x2ab   :  { %v681_v23 = vpop.f32.mrf.mxu0 }
 0x2ac   :  { %v682_v24 = vadd.f32 %v681_v23, %v680_v21 }
 0x2ad   :  { %v683_v25 = vpop.f32.mrf.mxu0 }
 0x2ae   :  { %v587_v26 = vadd.f32 %v682_v24, %v647_v22 }
 0x2af   :  { %v684_v27 = vpop.f32.mrf.mxu0 }
 0x2b0   :  { %592 = vst [vmem:[#allocation10] sm:$0xff] %v587_v26 }
 0x2b1   :  { %865 = shalt.err (!%p862_p10)
}
 0x2b2   :  { %602 = dma.vmem_to_hbm [thread:$0]  %s600_s26, 128, %s963_s7, [#allocation4]  }
 0x2b3   :  { %880 = dma.done.wait [#allocation4], 128  }
 0x2b4   :  { %881 = vsyncadd [#allocation4], 4294967168 }
 0x2b5   :  { %606 = vsyncpa [#allocation3], 1 }
 0x2b6   :  { %607 = vsyncpa [#allocation6], 1 }
 0x2b7   :  { %608 = vsyncpa [#allocation9], 1 }
 0x2b8   :  { %609 = vsyncpa [#allocation4], 1 }

</bundles_post_ra>
